<compile_context>
chip_gen: v5e
topology: v5e:2x2
jax: 0.10.0
libtpu: 0.0.40
codegen_flags: <defaults>
</compile_context>

<pallas_src>
import functools
import math

import jax
import jax.numpy as jnp
from jax.experimental import pallas as pl
from jax.experimental.pallas import tpu as pltpu


def _round_up(x, m):
    return ((x + m - 1) // m) * m


def _bilinear_resident_kernel(bias_ref, a_ref, w_ref, b_ref, o_ref, *, precision):
    # a_ref: (TB, n_big), w_ref: (n_big, n_min), b_ref: (TB, n_min), o_ref: (1, TB)
    t = jnp.dot(a_ref[...], w_ref[...],
                preferred_element_type=jnp.float32, precision=precision)
    y = jnp.sum(t * b_ref[...].astype(jnp.float32), axis=-1)        # (TB,)
    o_ref[0, :] = (y + bias_ref[0, 0]).astype(o_ref.dtype)          # lane-dense store


def _bilinear_ktiled_kernel(bias_ref, a_ref, w_ref, b_ref, o_ref, *, precision):
    # Grid = (batch tiles, K tiles); K is the innermost "arbitrary" axis and the
    # resident (1, TB) f32 output block is the accumulator.
    k = pl.program_id(1)

    @pl.when(k == 0)
    def _init():
        o_ref[...] = jnp.full(o_ref.shape, bias_ref[0, 0], dtype=o_ref.dtype)

    t = jnp.dot(a_ref[...], w_ref[...],
                preferred_element_type=jnp.float32, precision=precision)
    o_ref[0, :] += jnp.sum(t * b_ref[...].astype(jnp.float32), axis=-1)


def bilinear_classifier(x1, x2, w, bias, *,
                        target_tile_bytes=2 << 20,
                        vmem_budget_bytes=None,
                        k_tile=None,
                        precision=None):
    """x1: (B, n1), x2: (B, n2), w: (n1, n2), bias: (1,) or (1, 1) -> (B,).

    Pass precision=jax.lax.Precision.HIGHEST for strict f32 MXU parity with
    PyTorch fp32 (default uses the TPU's fast bf16 matmul passes).
    """
    B, n1 = x1.shape
    B2, n2 = x2.shape
    assert B2 == B, "x1 and x2 must share the batch dimension"
    assert w.shape == (n1, n2)
    bias = jnp.asarray(bias, jnp.float32).reshape(1, 1)

    # Orientation: MXU contraction over the larger feature dim so that the
    # elementwise multiply + lane reduce run over min(n1, n2).
    if n1 >= n2:
        a, b, wk = x1, x2, w
    else:
        a, b, wk = x2, x1, w.T
    n_big, n_min = wk.shape

    isz = x1.dtype.itemsize
    w_isz = w.dtype.itemsize

    # Per-generation VMEM budget (~75% of per-core capacity, capped).
    if vmem_budget_bytes is None:
        try:
            vmem_cap = pltpu.get_tpu_info().vmem_capacity_bytes
        except Exception:
            vmem_cap = 64 << 20                       # v7x per-core VMEM: safe everywhere
        vmem_budget_bytes = int(min(vmem_cap * 3 // 4, 112 << 20))
    vmem_limit_bytes = vmem_budget_bytes + (8 << 20)

    def fits(tb, tk, nk):
        need = (2 * tb * tk * isz                     # a tiles (double buffered)
                + 2 * tb * n_min * isz                # b tiles (double buffered)
                + (1 if nk == 1 else 2) * tk * n_min * w_isz
                + 2 * tb * 4                          # (1, TB) f32 output
                + 2 * tb * n_min * 4)                 # headroom: f32 intermediate
        return need <= vmem_budget_bytes

    # ---- batch tile ----
    if B < 128:
        tb = B                                        # single full block, no padding
    else:
        tb = _round_up(max(target_tile_bytes // (isz * (n_big + n_min)), 1), 128)
        tb = min(tb, _round_up(B, 128))
        tb = min(tb, _round_up(pl.cdiv(B, 2), 128))   # >= 2 tiles -> v7x megacore
        tb = max(tb, 128)

    # ---- contraction tile: resident W when it fits, K-tiled otherwise ----
    if k_tile is not None:
        tk = int(k_tile)
    elif fits(tb, n_big, 1):
        tk = n_big
    else:
        tk = n_big
        for m in range(n_big // 128, 0, -1):
            c = m * 128
            if n_big % c == 0 and fits(tb, c, n_big // c):
                tk = c
                break
        # TODO(synk): if n_big is not a multiple of 128 and W still does not fit
        # the budget, we fall through to resident W and rely on vmem_limit_bytes.
    if tk != n_big and (tk % 128 != 0 or n_big % tk != 0):
        tk = n_big            # partial K blocks would accumulate garbage; stay resident
    nk = pl.cdiv(n_big, tk)

    while tb > 128 and not fits(tb, tk, nk):
        tb = max(128, _round_up(tb // 2, 128))
    nt = pl.cdiv(B, tb)

    cost = pl.CostEstimate(
        flops=2 * B * n1 * n2 + 2 * B * n_min,
        transcendentals=0,
        bytes_accessed=isz * B * (n1 + n2) + w_isz * n1 * n2 + 4 * B,
    )
    out_shape = jax.ShapeDtypeStruct((1, B), jnp.float32)

    def call(single_buffer_w):
        if nk == 1:
            w_kwargs = dict(pipeline_mode=pl.Buffered(1)) if single_buffer_w else {}
            in_specs = [
                pl.BlockSpec(memory_space=pltpu.MemorySpace.SMEM),             # bias
                pl.BlockSpec((tb, n_big), lambda i: (i, 0)),                   # a tile
                pl.BlockSpec((n_big, n_min), lambda i: (0, 0), **w_kwargs),    # W resident
                pl.BlockSpec((tb, n_min), lambda i: (i, 0)),                   # b tile
            ]
            out_specs = pl.BlockSpec((1, tb), lambda i: (0, i))                # lane-dense
            grid = (nt,)
            dims = ("parallel",)
            kernel = functools.partial(_bilinear_resident_kernel, precision=precision)
        else:
            in_specs = [
                pl.BlockSpec(memory_space=pltpu.MemorySpace.SMEM),             # bias
                pl.BlockSpec((tb, tk), lambda i, k: (i, k)),                   # a tile
                pl.BlockSpec((tk, n_min), lambda i, k: (k, 0)),                # W K-slab
                pl.BlockSpec((tb, n_min), lambda i, k: (i, 0)),                # b tile
            ]
            out_specs = pl.BlockSpec((1, tb), lambda i, k: (0, i))
            grid = (nt, nk)
            dims = ("parallel", "arbitrary")
            kernel = functools.partial(_bilinear_ktiled_kernel, precision=precision)
        return pl.pallas_call(
            kernel,
            out_shape=out_shape,
            grid=grid,
            in_specs=in_specs,
            out_specs=out_specs,
            compiler_params=pltpu.CompilerParams(
                dimension_semantics=dims,
                vmem_limit_bytes=vmem_limit_bytes,
            ),
            cost_estimate=cost,
        )(bias, a, wk, b)

    if nk == 1:
        try:
            out = call(single_buffer_w=True)          # halves W's VMEM footprint
        except Exception:                             # pl.Buffered(1) unsupported -> default
            out = call(single_buffer_w=False)
    else:
        out = call(single_buffer_w=False)

    return out[0].astype(x1.dtype)                    # (B,), mirrors .squeeze(-1)


if __name__ == "__main__":
    root = jax.random.PRNGKey(0)

    def make_case(cid, B, n1, n2):
        ks = jax.random.split(jax.random.fold_in(root, cid), 4)
        x1 = jax.random.normal(ks[0], (B, n1), jnp.float32)
        x2 = jax.random.normal(ks[1], (B, n2), jnp.float32)
        bound = 1.0 / math.sqrt(n1)                   # nn.Bilinear init range
        w = jax.random.uniform(ks[2], (n1, n2), jnp.float32, -bound, bound)
        bias = jax.random.uniform(ks[3], (1,), jnp.float32, -bound, bound)
        return x1, x2, w, bias

    def reference(x1, x2, w, bias):
        # Same contraction orientation as the kernel so the comparison is not
        # dominated by the TPU's default (bf16-pass) f32 matmul precision.
        n1, n2 = w.shape
        if n1 >= n2:
            y = jnp.sum(jnp.dot(x1, w) * x2, axis=-1)
        else:
            y = jnp.sum(jnp.dot(x2, w.T) * x1, axis=-1)
        return y + bias[0]

    cases = [
        # (cid, B,   n1,  n2,  k_tile)
        (0,     8,   32,  16,  None),   # small batch, n1 >= n2, resident W
        (1,     130, 16,  48,  None),   # ragged batch (2 tiles), swapped orientation
        (2,     96,  256, 128, 128),    # forced K-tiled accumulation path
    ]
    for cid, B, n1, n2, kt in cases:
        x1, x2, w, bias = make_case(cid, B, n1, n2)
        out = jax.block_until_ready(bilinear_classifier(x1, x2, w, bias, k_tile=kt))
        ref = reference(x1, x2, w, bias)
        assert out.shape == (B,)
        # Tolerance covers the TPU's default bf16-pass f32 matmul; pass
        # precision=jax.lax.Precision.HIGHEST to the wrapper for strict parity.
        assert jnp.allclose(out, ref, atol=2e-2, rtol=2e-2), (
            f"case {cid}: max abs err {jnp.max(jnp.abs(out - ref))}")

    print("KERNEL_OK")
</pallas_src>

<mosaic_0001>
module attributes {stable_mosaic.version = 11 : i64} {
  func.func @_bilinear_resident_kernel(%arg0: i32, %arg1: memref<1x1xf32, #tpu.memory_space<smem>>, %arg2: memref<8x32xf32, #tpu.memory_space<vmem>>, %arg3: memref<32x16xf32, #tpu.memory_space<vmem>>, %arg4: memref<8x16xf32, #tpu.memory_space<vmem>>, %arg5: memref<1x8xf32, #tpu.memory_space<vmem>>) attributes {dimension_semantics = [#tpu.dimension_semantics<parallel>], iteration_bounds = array<i64: 1>, scalar_prefetch = 0 : i64, scratch_operands = 0 : i64, tpu.core_type = #tpu.core_type<tc>, window_params = [{transform_indices = @transform_0, window_bounds = array<i64: 1, 1>}, {transform_indices = @transform_1, window_bounds = array<i64: 8, 32>}, {pipeline_mode = #tpu.pipeline_mode<synchronous>, transform_indices = @transform_2, window_bounds = array<i64: 32, 16>}, {transform_indices = @transform_3, window_bounds = array<i64: 8, 16>}, {transform_indices = @transform_4, window_bounds = array<i64: 1, 8>}]} {
    %c0 = arith.constant 0 : index
    %c0_0 = arith.constant 0 : index
    %0 = vector.load %arg2[%c0, %c0_0] : memref<8x32xf32, #tpu.memory_space<vmem>>, vector<8x32xf32>
    %c0_1 = arith.constant 0 : index
    %c0_2 = arith.constant 0 : index
    %1 = vector.load %arg3[%c0_1, %c0_2] : memref<32x16xf32, #tpu.memory_space<vmem>>, vector<32x16xf32>
    %cst = arith.constant dense<0.000000e+00> : vector<8x16xf32>
    %2 = tpu.matmul %0, %1, %cst {dimension_numbers = #tpu.dot_dimension_numbers<[1], [0], [0], [1], [0, 0, 1, 1], [], []>} : vector<8x32xf32>, vector<32x16xf32>, vector<8x16xf32> -> vector<8x16xf32>
    %c0_3 = arith.constant 0 : index
    %c0_4 = arith.constant 0 : index
    %3 = vector.load %arg4[%c0_3, %c0_4] : memref<8x16xf32, #tpu.memory_space<vmem>>, vector<8x16xf32>
    %4 = arith.mulf %2, %3 : vector<8x16xf32>
    %cst_5 = arith.constant dense<0.000000e+00> : vector<8xf32>
    %5 = vector.multi_reduction <add>, %4, %cst_5 [1] : vector<8x16xf32> to vector<8xf32>
    %c0_6 = arith.constant 0 : index
    %c0_7 = arith.constant 0 : index
    %6 = memref.load %arg1[%c0_6, %c0_7] : memref<1x1xf32, #tpu.memory_space<smem>>
    %7 = vector.broadcast %6 : f32 to vector<8xf32>
    %8 = arith.addf %5, %7 : vector<8xf32>
    %c0_8 = arith.constant 0 : index
    %c0_9 = arith.constant 0 : index
    %9 = vector.load %arg5[%c0_8, %c0_9] : memref<1x8xf32, #tpu.memory_space<vmem>>, vector<1x8xf32>
    %10 = vector.shape_cast %9 : vector<1x8xf32> to vector<8xf32>
    %11 = vector.shape_cast %8 : vector<8xf32> to vector<1x8xf32>
    tpu.vector_store %arg5[%c0_8, %c0_9], %11 {strides = array<i32>} : memref<1x8xf32, #tpu.memory_space<vmem>>, vector<1x8xf32>,
    return
  }
  func.func @transform_0(%arg0: i32) -> (i32, i32) {
    %c0_i32 = arith.constant 0 : i32
    %c0_i32_0 = arith.constant 0 : i32
    %c0_i32_1 = arith.constant 0 : i32
    return %c0_i32, %c0_i32_0 : i32, i32
  }
  func.func @transform_1(%arg0: i32) -> (i32, i32) {
    %c0_i32 = arith.constant 0 : i32
    %c0_i32_0 = arith.constant 0 : i32
    return %arg0, %c0_i32 : i32, i32
  }
  func.func @transform_2(%arg0: i32) -> (i32, i32) {
    %c0_i32 = arith.constant 0 : i32
    %c0_i32_0 = arith.constant 0 : i32
    %c0_i32_1 = arith.constant 0 : i32
    return %c0_i32, %c0_i32_0 : i32, i32
  }
  func.func @transform_3(%arg0: i32) -> (i32, i32) {
    %c0_i32 = arith.constant 0 : i32
    %c0_i32_0 = arith.constant 0 : i32
    return %arg0, %c0_i32 : i32, i32
  }
  func.func @transform_4(%arg0: i32) -> (i32, i32) {
    %c0_i32 = arith.constant 0 : i32
    %c0_i32_0 = arith.constant 0 : i32
    return %c0_i32, %arg0 : i32, i32
  }
}

module attributes {stable_mosaic.version = 11 : i64} {
  func.func @_bilinear_resident_kernel(%arg0: i32, %arg1: memref<1x1xf32, #tpu.memory_space<smem>>, %arg2: memref<8x32xf32, #tpu.memory_space<vmem>>, %arg3: memref<32x16xf32, #tpu.memory_space<vmem>>, %arg4: memref<8x16xf32, #tpu.memory_space<vmem>>, %arg5: memref<1x8xf32, #tpu.memory_space<vmem>>) attributes {dimension_semantics = [#tpu.dimension_semantics<parallel>], iteration_bounds = array<i64: 1>, scalar_prefetch = 0 : i64, scratch_operands = 0 : i64, tpu.core_type = #tpu.core_type<tc>, window_params = [{transform_indices = @transform_0, window_bounds = array<i64: 1, 1>}, {transform_indices = @transform_1, window_bounds = array<i64: 8, 32>}, {pipeline_mode = #tpu.pipeline_mode<synchronous>, transform_indices = @transform_2, window_bounds = array<i64: 32, 16>}, {transform_indices = @transform_3, window_bounds = array<i64: 8, 16>}, {transform_indices = @transform_4, window_bounds = array<i64: 1, 8>}]} {
    %c0 = arith.constant 0 : index
    %c0_0 = arith.constant 0 : index
    %0 = vector.load %arg2[%c0, %c0_0] : memref<8x32xf32, #tpu.memory_space<vmem>>, vector<8x32xf32>
    %c0_1 = arith.constant 0 : index
    %c0_2 = arith.constant 0 : index
    %1 = vector.load %arg3[%c0_1, %c0_2] : memref<32x16xf32, #tpu.memory_space<vmem>>, vector<32x16xf32>
    %cst = arith.constant dense<0.000000e+00> : vector<8x16xf32>
    %2 = tpu.matmul %0, %1, %cst {dimension_numbers = #tpu.dot_dimension_numbers<[1], [0], [0], [1], [0, 0, 1, 1], [], []>} : vector<8x32xf32>, vector<32x16xf32>, vector<8x16xf32> -> vector<8x16xf32>
    %c0_3 = arith.constant 0 : index
    %c0_4 = arith.constant 0 : index
    %3 = vector.load %arg4[%c0_3, %c0_4] : memref<8x16xf32, #tpu.memory_space<vmem>>, vector<8x16xf32>
    %4 = arith.mulf %2, %3 : vector<8x16xf32>
    %cst_5 = arith.constant dense<0.000000e+00> : vector<8xf32>
    %5 = vector.multi_reduction <add>, %4, %cst_5 [1] : vector<8x16xf32> to vector<8xf32>
    %c0_6 = arith.constant 0 : index
    %c0_7 = arith.constant 0 : index
    %6 = memref.load %arg1[%c0_6, %c0_7] : memref<1x1xf32, #tpu.memory_space<smem>>
    %7 = vector.broadcast %6 : f32 to vector<8xf32>
    %8 = arith.addf %5, %7 : vector<8xf32>
    %c0_8 = arith.constant 0 : index
    %c0_9 = arith.constant 0 : index
    %9 = vector.load %arg5[%c0_8, %c0_9] : memref<1x8xf32, #tpu.memory_space<vmem>>, vector<1x8xf32>
    %10 = vector.shape_cast %9 : vector<1x8xf32> to vector<8xf32>
    %11 = vector.shape_cast %8 : vector<8xf32> to vector<1x8xf32>
    tpu.vector_store %arg5[%c0_8, %c0_9], %11 {strides = array<i32>} : memref<1x8xf32, #tpu.memory_space<vmem>>, vector<1x8xf32>,
    return
  }
  func.func @transform_0(%arg0: i32) -> (i32, i32) {
    %c0_i32 = arith.constant 0 : i32
    %c0_i32_0 = arith.constant 0 : i32
    %c0_i32_1 = arith.constant 0 : i32
    return %c0_i32, %c0_i32_0 : i32, i32
  }
  func.func @transform_1(%arg0: i32) -> (i32, i32) {
    %c0_i32 = arith.constant 0 : i32
    %c0_i32_0 = arith.constant 0 : i32
    return %arg0, %c0_i32 : i32, i32
  }
  func.func @transform_2(%arg0: i32) -> (i32, i32) {
    %c0_i32 = arith.constant 0 : i32
    %c0_i32_0 = arith.constant 0 : i32
    %c0_i32_1 = arith.constant 0 : i32
    return %c0_i32, %c0_i32_0 : i32, i32
  }
  func.func @transform_3(%arg0: i32) -> (i32, i32) {
    %c0_i32 = arith.constant 0 : i32
    %c0_i32_0 = arith.constant 0 : i32
    return %arg0, %c0_i32 : i32, i32
  }
  func.func @transform_4(%arg0: i32) -> (i32, i32) {
    %c0_i32 = arith.constant 0 : i32
    %c0_i32_0 = arith.constant 0 : i32
    return %c0_i32, %arg0 : i32, i32
  }
}

</mosaic_0001>

<bundles_post_ra>
// kernel: tpu_custom_call.1
= control target key start
LH: loop header
LB: loop body
LE: loop exit
PB: predicated region body
PF: predicated region fallthrough
CT: control target
= control target key end

     0   :  { %s158_s0 = inlined_call_operand.<no memory space> [shape: f32[1,1], index: 0, kind: input, shape index: {}]   ;;  %s159_s1 = inlined_call_operand.vmem [shape: f32[8,32], index: 1, kind: input, shape index: {}]   ;;  %s160_s2 = inlined_call_operand.vmem [shape: f32[32,16], index: 2, kind: input, shape index: {}]   ;;  %s161_s3 = inlined_call_operand.vmem [shape: f32[8,16], index: 3, kind: input, shape index: {}]   ;;  %s162_s4 = inlined_call_operand.hbm [shape: f32[1,8], index: 4, kind: output, shape index: {}]  }
   0x1   :  { %v23_v0 = vld [vmem:[%s160_s2 + $0x18] sm:$0xff]  ;;  %v22_v1 = vld [vmem:[%s160_s2 + $0x10] sm:$0xff] }
   0x2   :  { %40 = vmatpush.msra.mxu0 %v23_v0 }
   0x3   :  { %10 = vsyncpa [#allocation4], 0  ;;  %v21_v2 = vld [vmem:[%s160_s2 + $0x8] sm:$0xff]  ;;  %v20_v3 = vld [vmem:[%s160_s2] sm:$0xff]  ;;  %vm24_vm0 = vcmask 261120   ;;  %vm50_vm1 = vcmask 130048   ;;  %v58_v9 = vlaneseq  ;;  %v55_v10 = vstv %s158_s0 }
   0x4   :  { %41 = vmatpush.msra.mxu0 %v22_v1  ;;  %v19_v4 = vld [vmem:[%s159_s1] sm:$0xff]  ;;  %s108_s1 = smov [#allocation3]   ;;  %s71_s5 = sshll.u32 %s162_s4, 4  ;;  %vm62_vm2 = vcmask 57344   ;;  %s72_s5 = int_to_ptr.hbm [resolvable:$true] %s71_s5 }
   0x5   :  { %v48_v5 = vld [vmem:[%s161_s3] sm:$0xff]  ;;  %v59_v11 = vand.u32 127, %v58_v9  ;;  %s69_s28 = sshll.u32 %s108_s1, 4  ;;  %s70_s28 = int_to_ptr.vmem [resolvable:$true] %s69_s28 }
   0x6   :  { %42 = vmatpush.msra.mxu0 %v21_v2 }
   0x8   :  { %43 = vmatpush.msra.mxu0 %v20_v3 }
   0x9   :  { %80 = vmatmul.msk.f32.vlgmr.msra.gmra.mxu0 %vm24_vm0, %v19_v4 }
  0x86   :  { %v45_v6 = vpop.f32.mrf.mxu0 }
  0x87   :  { %v49_v7 = vmul.f32 %v48_v5, %v45_v6 }
  0x89   :  { %v51_v8 = vsel %vm50_vm1, %v49_v7, 0.0 }
  0x8a   :  { %52 = vadd.xlane.f32.xlu0 %v51_v8 }
  0xfd   :  { %v53_v12 = vpop.xlane.xlu0 %52 }
  0xfe   :  { %v56_v13 = vadd.f32 %v55_v10, %v53_v12 }
 0x100   :  { %v60_v14 = vperm.slane %v56_v13, %v59_v11 }
 0x102   :  { %63 = vst.msk [vmem:[#allocation3] sm:$0x1] %vm62_vm2, %v60_v14 }
 0x103   :  { %74 = dma.vmem_to_hbm [thread:$0]  %s70_s28, 16, %s72_s5, [#allocation4]  }
 0x104   :  { %106 = dma.done.wait [#allocation4], 16  }
 0x105   :  { %107 = vsyncadd [#allocation4], 4294967280 }
 0x106   :  { %79 = vsyncpa [#allocation4], 1 }

// kernel: tpu_custom_call.1
= control target key start
LH: loop header
LB: loop body
LE: loop exit
PB: predicated region body
PF: predicated region fallthrough
CT: control target
= control target key end

     0   :  { %s158_s0 = inlined_call_operand.<no memory space> [shape: f32[1,1], index: 0, kind: input, shape index: {}]   ;;  %s159_s1 = inlined_call_operand.vmem [shape: f32[8,32], index: 1, kind: input, shape index: {}]   ;;  %s160_s2 = inlined_call_operand.vmem [shape: f32[32,16], index: 2, kind: input, shape index: {}]   ;;  %s161_s3 = inlined_call_operand.vmem [shape: f32[8,16], index: 3, kind: input, shape index: {}]   ;;  %s162_s4 = inlined_call_operand.hbm [shape: f32[1,8], index: 4, kind: output, shape index: {}]  }
   0x1   :  { %v23_v0 = vld [vmem:[%s160_s2 + $0x18] sm:$0xff]  ;;  %v22_v1 = vld [vmem:[%s160_s2 + $0x10] sm:$0xff] }
   0x2   :  { %40 = vmatpush.msra.mxu0 %v23_v0 }
   0x3   :  { %10 = vsyncpa [#allocation4], 0  ;;  %v21_v2 = vld [vmem:[%s160_s2 + $0x8] sm:$0xff]  ;;  %v20_v3 = vld [vmem:[%s160_s2] sm:$0xff]  ;;  %vm24_vm0 = vcmask 261120   ;;  %vm50_vm1 = vcmask 130048   ;;  %v58_v9 = vlaneseq  ;;  %v55_v10 = vstv %s158_s0 }
   0x4   :  { %41 = vmatpush.msra.mxu0 %v22_v1  ;;  %v19_v4 = vld [vmem:[%s159_s1] sm:$0xff]  ;;  %s108_s1 = smov [#allocation3]   ;;  %s71_s5 = sshll.u32 %s162_s4, 4  ;;  %vm62_vm2 = vcmask 57344   ;;  %s72_s5 = int_to_ptr.hbm [resolvable:$true] %s71_s5 }
   0x5   :  { %v48_v5 = vld [vmem:[%s161_s3] sm:$0xff]  ;;  %v59_v11 = vand.u32 127, %v58_v9  ;;  %s69_s28 = sshll.u32 %s108_s1, 4  ;;  %s70_s28 = int_to_ptr.vmem [resolvable:$true] %s69_s28 }
   0x6   :  { %42 = vmatpush.msra.mxu0 %v21_v2 }
   0x8   :  { %43 = vmatpush.msra.mxu0 %v20_v3 }
   0x9   :  { %80 = vmatmul.msk.f32.vlgmr.msra.gmra.mxu0 %vm24_vm0, %v19_v4 }
  0x86   :  { %v45_v6 = vpop.f32.mrf.mxu0 }
  0x87   :  { %v49_v7 = vmul.f32 %v48_v5, %v45_v6 }
  0x89   :  { %v51_v8 = vsel %vm50_vm1, %v49_v7, 0.0 }
  0x8a   :  { %52 = vadd.xlane.f32.xlu0 %v51_v8 }
  0xfd   :  { %v53_v12 = vpop.xlane.xlu0 %52 }
  0xfe   :  { %v56_v13 = vadd.f32 %v55_v10, %v53_v12 }
 0x100   :  { %v60_v14 = vperm.slane %v56_v13, %v59_v11 }
 0x102   :  { %63 = vst.msk [vmem:[#allocation3] sm:$0x1] %vm62_vm2, %v60_v14 }
 0x103   :  { %74 = dma.vmem_to_hbm [thread:$0]  %s70_s28, 16, %s72_s5, [#allocation4]  }
 0x104   :  { %106 = dma.done.wait [#allocation4], 16  }
 0x105   :  { %107 = vsyncadd [#allocation4], 4294967280 }
 0x106   :  { %79 = vsyncpa [#allocation4], 1 }

</bundles_post_ra>
